<compile_context>
chip_gen: v7x
topology: tpu7x:2x2x1
jax: 0.10.0
libtpu: 0.0.40
codegen_flags: <defaults>
</compile_context>

<pallas_src>
import math

import jax
import jax.numpy as jnp
from jax.experimental import pallas as pl
from jax.experimental.pallas import tpu as pltpu

_TARGET_BLOCK_BYTES = 2 * 1024 * 1024   # ~2 MiB per x block: mem-bound sweet spot, safe on v5e/v6e/v7x
_LANE = 128
_SUBLANE = 8


def _pmish_kernel(a_ref, x_ref, o_ref):
    # a_ref: (1, tile_c) f32 = sigmoid(alpha) laid out along lanes (broadcasts over sublanes)
    # x_ref / o_ref: (tile_m, tile_c)
    x = x_ref[...].astype(jnp.float32)
    a = a_ref[...]
    # tanh(softplus(x)) = (e^{2x} + 2 e^x) / (e^{2x} + 2 e^x + 2), stabilized with t = exp(-|x|).
    t = jnp.exp(-jnp.abs(x))
    pos = x >= 0.0
    num = jnp.where(pos, 1.0 + 2.0 * t, t * t + 2.0 * t)
    den = num + jnp.where(pos, 2.0 * t * t, 2.0)
    mish = x * (num / den)
    # y = a*mish + (1-a)*x, rewritten as x + a*(mish - x) (one fewer multiply, no (1-a)).
    o_ref[...] = (x + a * (mish - x)).astype(o_ref.dtype)


@jax.jit
def parametric_mish(x, alpha):
    """x: [..., D]; alpha: [D] raw (pre-sigmoid) parameter. Returns same shape/dtype as x."""
    orig_shape = x.shape
    d = orig_shape[-1]
    assert alpha.shape == (d,)

    # Hoist the gate computation: one tiny sigmoid in the wrapper.
    a_sig = jax.nn.sigmoid(alpha.astype(jnp.float32))

    x2 = x.reshape(-1, d)                       # [M, D] (free reshape, contiguous)
    m = x2.shape[0]

    # Lane-dense fold for small D: pack r rows into c = lcm(D, 128) lanes so the output
    # spec is lane-dense (unmasked full-width stores). Only when it is a pure reshape
    # (m % r == 0) -- no padding, no extra HBM pass. Otherwise fall back to c = D.
    folded = False
    c, m2 = d, m
    if 0 < d < _LANE:
        c_fold = d * _LANE // math.gcd(d, _LANE)   # lcm(d, 128), a multiple of 128
        r = c_fold // d
        if m % r == 0 and m >= r:
            folded = True
            c = c_fold
            m2 = m // r
            x2 = x2.reshape(m2, c)
            a_row = jnp.tile(a_sig, r).reshape(1, c)
    if not folded:
        a_row = a_sig.reshape(1, c)

    itemsize = x2.dtype.itemsize

    # Column tiling only if a minimal 8-row block would blow the block budget (huge D).
    if _SUBLANE * c * itemsize <= _TARGET_BLOCK_BYTES:
        tile_c = c
    else:
        tile_c = max(_LANE, (_TARGET_BLOCK_BYTES // (_SUBLANE * itemsize)) // _LANE * _LANE)
        tile_c = min(tile_c, pl.cdiv(c, _LANE) * _LANE)
    grid_c = pl.cdiv(c, tile_c)

    # Row tile: ~2 MiB per x block, multiple of 8 sublanes, not (much) larger than the data.
    if m2 <= _SUBLANE:
        tile_m = m2                              # block == full row extent (allowed)
    else:
        row_bytes = tile_c * itemsize
        tile_m = max(_SUBLANE, (_TARGET_BLOCK_BYTES // row_bytes) // _SUBLANE * _SUBLANE)
        tile_m = min(tile_m, pl.cdiv(m2, _SUBLANE) * _SUBLANE)
        # Ensure >= 2 row steps when data allows, so v7x's two TensorCores both run.
        if pl.cdiv(m2, tile_m) < 2:
            half = (m2 // 2) // _SUBLANE * _SUBLANE
            if half >= _SUBLANE:
                tile_m = half
    grid_m = pl.cdiv(m2, tile_m)                 # ragged last block handled by Pallas

    out = pl.pallas_call(
        _pmish_kernel,
        out_shape=jax.ShapeDtypeStruct((m2, c), x.dtype),
        grid_spec=pl.GridSpec(
            grid=(grid_m, grid_c),
            in_specs=[
                pl.BlockSpec((1, tile_c), lambda i, j: (0, j)),        # gate row
                pl.BlockSpec((tile_m, tile_c), lambda i, j: (i, j)),   # x tile
            ],
            out_specs=pl.BlockSpec((tile_m, tile_c), lambda i, j: (i, j)),
        ),
        compiler_params=pltpu.CompilerParams(
            dimension_semantics=("parallel", "parallel"),
        ),
    )(a_row, x2)

    return out.reshape(orig_shape)


def _reference(x, alpha):
    a = jax.nn.sigmoid(alpha.astype(jnp.float32))
    xf = x.astype(jnp.float32)
    mish = xf * jnp.tanh(jax.nn.softplus(xf))
    return (a * mish + (1.0 - a) * xf).astype(x.dtype)


if __name__ == "__main__":
    key = jax.random.PRNGKey(0)
    kx, ka, kx2 = jax.random.split(key, 3)

    # Primary check: MLP-encoder-like activation [batch, seq, dim] (lane-fold path).
    dim = 32
    batch, seq = 2, 8
    x = jax.random.normal(kx, (batch, seq, dim), dtype=jnp.float32)
    alpha_param = 0.5 * jax.random.normal(ka, (dim,), dtype=jnp.float32)

    y = jax.block_until_ready(parametric_mish(x, alpha_param))
    y_ref = _reference(x, alpha_param)
    assert y.shape == x.shape and y.dtype == x.dtype
    assert jnp.allclose(y, y_ref, atol=1e-5, rtol=1e-5), "mismatch vs reference (folded path)"

    # Secondary check: non-aligned shape exercising the unfolded / ragged-grid path.
    dim2 = 48
    x_b = jax.random.normal(kx2, (5, 7, dim2), dtype=jnp.float32)
    alpha_b = 0.5 * jax.random.normal(ka, (dim2,), dtype=jnp.float32)
    y_b = jax.block_until_ready(parametric_mish(x_b, alpha_b))
    assert jnp.allclose(y_b, _reference(x_b, alpha_b), atol=1e-5, rtol=1e-5), \
        "mismatch vs reference (ragged path)"

    print("KERNEL_OK")
</pallas_src>

<mosaic_0001>
module attributes {stable_mosaic.version = 11 : i64} {
  func.func @_pmish_kernel(%arg0: i32, %arg1: i32, %arg2: memref<1x128xf32, #tpu.memory_space<vmem>>, %arg3: memref<4x128xf32, #tpu.memory_space<vmem>>, %arg4: memref<4x128xf32, #tpu.memory_space<vmem>>) attributes {dimension_semantics = [#tpu.dimension_semantics<parallel>, #tpu.dimension_semantics<parallel>], iteration_bounds = array<i64: 1, 1>, scalar_prefetch = 0 : i64, scratch_operands = 0 : i64, tpu.core_type = #tpu.core_type<tc>, window_params = [{transform_indices = @transform_0, window_bounds = array<i64: 1, 128>}, {transform_indices = @transform_1, window_bounds = array<i64: 4, 128>}, {transform_indices = @transform_2, window_bounds = array<i64: 4, 128>}]} {
    %c0 = arith.constant 0 : index
    %c0_0 = arith.constant 0 : index
    %0 = vector.load %arg3[%c0, %c0_0] : memref<4x128xf32, #tpu.memory_space<vmem>>, vector<4x128xf32>
    %c0_1 = arith.constant 0 : index
    %c0_2 = arith.constant 0 : index
    %1 = vector.load %arg2[%c0_1, %c0_2] : memref<1x128xf32, #tpu.memory_space<vmem>>, vector<1x128xf32>
    %2 = math.absf %0 : vector<4x128xf32>
    %cst = arith.constant 0.000000e+00 : f32
    %3 = vector.broadcast %cst : f32 to vector<4x128xf32>
    %4 = arith.subf %3, %2 : vector<4x128xf32>
    %5 = math.exp %4 : vector<4x128xf32>
    %cst_3 = arith.constant 0.000000e+00 : f32
    %6 = vector.broadcast %cst_3 : f32 to vector<4x128xf32>
    %7 = arith.cmpf oge, %0, %6 : vector<4x128xf32>
    %cst_4 = arith.constant 2.000000e+00 : f32
    %8 = vector.broadcast %cst_4 : f32 to vector<4x128xf32>
    %9 = arith.mulf %8, %5 : vector<4x128xf32>
    %cst_5 = arith.constant 1.000000e+00 : f32
    %10 = vector.broadcast %cst_5 : f32 to vector<4x128xf32>
    %11 = arith.addf %10, %9 : vector<4x128xf32>
    %12 = arith.mulf %5, %5 : vector<4x128xf32>
    %cst_6 = arith.constant 2.000000e+00 : f32
    %13 = vector.broadcast %cst_6 : f32 to vector<4x128xf32>
    %14 = arith.mulf %13, %5 : vector<4x128xf32>
    %15 = arith.addf %12, %14 : vector<4x128xf32>
    %16 = arith.select %7, %11, %15 : vector<4x128xi1>, vector<4x128xf32>
    %cst_7 = arith.constant 2.000000e+00 : f32
    %17 = vector.broadcast %cst_7 : f32 to vector<4x128xf32>
    %18 = arith.mulf %17, %5 : vector<4x128xf32>
    %19 = arith.mulf %18, %5 : vector<4x128xf32>
    %cst_8 = arith.constant 2.000000e+00 : f32
    %20 = vector.broadcast %cst_8 : f32 to vector<4x128xf32>
    %21 = arith.select %7, %19, %20 : vector<4x128xi1>, vector<4x128xf32>
    %22 = arith.addf %16, %21 : vector<4x128xf32>
    %23 = arith.divf %16, %22 : vector<4x128xf32>
    %24 = arith.mulf %0, %23 : vector<4x128xf32>
    %25 = arith.subf %24, %0 : vector<4x128xf32>
    %26 = vector.broadcast %1 : vector<1x128xf32> to vector<4x128xf32>
    %27 = arith.mulf %26, %25 : vector<4x128xf32>
    %28 = arith.addf %0, %27 : vector<4x128xf32>
    %c0_9 = arith.constant 0 : index
    %c0_10 = arith.constant 0 : index
    %29 = vector.load %arg4[%c0_9, %c0_10] : memref<4x128xf32, #tpu.memory_space<vmem>>, vector<4x128xf32>
    tpu.vector_store %arg4[%c0_9, %c0_10], %28 {strides = array<i32>} : memref<4x128xf32, #tpu.memory_space<vmem>>, vector<4x128xf32>,
    return
  }
  func.func @transform_0(%arg0: i32, %arg1: i32) -> (i32, i32) {
    %c0_i32 = arith.constant 0 : i32
    %c0_i32_0 = arith.constant 0 : i32
    return %c0_i32, %arg1 : i32, i32
  }
  func.func @transform_1(%arg0: i32, %arg1: i32) -> (i32, i32) {
    %c0_i32 = arith.constant 0 : i32
    return %arg0, %arg1 : i32, i32
  }
  func.func @transform_2(%arg0: i32, %arg1: i32) -> (i32, i32) {
    %c0_i32 = arith.constant 0 : i32
    return %arg0, %arg1 : i32, i32
  }
}

</mosaic_0001>

<bundles_post_ra>
// kernel: tile.8
= control target key start
LH: loop header
LB: loop body
LE: loop exit
PB: predicated region body
PF: predicated region fallthrough
CT: control target
= control target key end

     0   :  { %s22_s0 = inlined_call_operand.vmem [shape: f32[32], index: 0, kind: input, shape index: {}]   ;;  %s23_s1 = inlined_call_operand.vmem [shape: f32[4,32], index: 1, kind: output, shape index: {}]  }
   0x1   :  { %v4_v0 = vld [vmem:[%s22_s0] ss:$0 sm:$0xff] }
   0x2   :  { %5 = vst [vmem:[%s23_s1] sm:$0xf] %v4_v0 }

// kernel: tile.9
= control target key start
LH: loop header
LB: loop body
LE: loop exit
PB: predicated region body
PF: predicated region fallthrough
CT: control target
= control target key end

     0   :  { %vm7_vm0 = vcmask 261120   ;;  %s37_s8 = smov 32   ;;  %s38_s9 = smov 64   ;;  %vm13_vm1 = vcmask 1048320   ;;  %vm19_vm2 = vcmask 785920   ;;  %vm25_vm3 = vcmask 523520   ;;  %s55_s0 = inlined_call_operand.vmem [shape: f32[4,32], index: 0, kind: input, shape index: {}]   ;;  %s56_s1 = inlined_call_operand.vmem [shape: f32[1,128], index: 1, kind: output, shape index: {}]  }
   0x1   :  { %v4_v0 = vld [vmem:[%s55_s0] sm:$0xf]  ;;  %s36_s0 = smov 96  }
   0x2   :  { %5 = vst [vmem:[#allocation1] sm:$0xf] %v4_v0 }
   0x9   :  { %v10_v1 = vld [vmem:[#allocation1 + $0x3] sm:$0x1]   ;;  %v22_v2 = vld [vmem:[#allocation1 + $0x1] sm:$0x1]   ;;  %v6_v3 = vld [vmem:[#allocation1] sm:$0x1]  }
   0xa   :  { %11 = vrot.lane.b32.xlu0 %v10_v1, %s36_s0  ;;  %23 = vrot.lane.b32.xlu1 %v22_v2, %s37_s8  ;;  %v16_v4 = vld [vmem:[#allocation1 + $0x2] sm:$0x1]   ;;  %8 = vst.msk [vmem:[#allocation0] sm:$0x1] %vm7_vm0, %v6_v3  }
   0xe   :  { %17 = vrot.lane.b32.xlu0 %v16_v4, %s38_s9 }
  0x7c   :  { %v12_v5 = vpop.permute.xlu0 %11   ;;  %v24_v6 = vpop.permute.xlu1 %23  }
  0x7d   :  { %14 = vst.msk [vmem:[#allocation0] sm:$0x1] %vm13_vm1, %v12_v5  }
  0x80   :  { %v18_v7 = vpop.permute.xlu0 %17  }
  0x81   :  { %20 = vst.msk [vmem:[#allocation0] sm:$0x1] %vm19_vm2, %v18_v7  }
  0x82   :  { %26 = vst.msk [vmem:[#allocation0] sm:$0x1] %vm25_vm3, %v24_v6  }
  0x89   :  { %v30_v8 = vld [vmem:[#allocation0] sm:$0x1] }
  0x8a   :  { %32 = vst [vmem:[%s56_s1] sm:$0x1] %v30_v8 }

// kernel: parametric_mish.1
= control target key start
LH: loop header
LB: loop body
LE: loop exit
PB: predicated region body
PF: predicated region fallthrough
CT: control target
= control target key end

     0   :  { %s72_s1 = inlined_call_operand.vmem [shape: f32[4,128], index: 1, kind: input, shape index: {}]   ;;  %s73_s0 = inlined_call_operand.vmem [shape: f32[1,128], index: 0, kind: input, shape index: {}]   ;;  %s74_s2 = inlined_call_operand.vmem [shape: f32[4,128], index: 2, kind: output, shape index: {}]  }
   0x1   :  { %v11_v0 = vld [vmem:[%s72_s1] sm:$0xf] }
   0x2   :  { %v13_v1 = vand.u32 2147483647, %v11_v0  ;;  %vm17_vm0 = vcmp.ge.f32.partialorder %v11_v0, 0.0  ;;  %v43_v16 = vld [vmem:[%s73_s0] ss:$0 sm:$0xff] }
   0x4   :  { %v14_v2 = vsub.f32 0.0, %v13_v1 }
   0x6   :  { %v15_v3 = vmul.f32 1.442695, %v14_v2 }
   0x8   :  { %44 = vpow2.f32 %v15_v3 }
  0x12   :  { %v45_v4 = vpop.eup %44 }
  0x13   :  { %v18_v5 = vmul.f32 2.0, %v45_v4  ;;  %v20_v6 = vmul.f32 %v45_v4, %v45_v4 }
  0x15   :  { %v19_v7 = vadd.f32 1.0, %v18_v5  ;;  %v21_v8 = vadd.f32 %v20_v6, %v18_v5  ;;  %v23_v9 = vmul.f32 %v45_v4, %v18_v5 }
  0x17   :  { %v22_v10 = vsel %vm17_vm0, %v19_v7, %v21_v8  ;;  %v24_v11 = vsel %vm17_vm0, %v23_v9, 2.0 }
  0x18   :  { %v25_v12 = vadd.f32 %v24_v11, %v22_v10 }
  0x1a   :  { %46 = vrcp.f32 %v25_v12 }
  0x24   :  { %v47_v13 = vpop.eup %46 }
  0x25   :  { %v27_v14 = vmul.f32 %v47_v13, %v22_v10 }
  0x27   :  { %v28_v15 = vmul.f32 %v27_v14, %v11_v0 }
  0x29   :  { %v29_v17 = vsub.f32 %v28_v15, %v11_v0 }
  0x2b   :  { %v36_v18 = vmul.f32 %v43_v16, %v29_v17 }
  0x2d   :  { %v37_v19 = vadd.f32 %v36_v18, %v11_v0 }
  0x2f   :  { %38 = vst [vmem:[%s74_s2] sm:$0xf] %v37_v19 }

</bundles_post_ra>
